<compile_context>
chip_gen: v7x
topology: tpu7x:2x2x1
jax: 0.10.0
libtpu: 0.0.40
codegen_flags: <defaults>
</compile_context>

<pallas_src>
import jax
import jax.numpy as jnp
from jax.experimental import pallas as pl
from jax.experimental.pallas import tpu as pltpu


def _mvc_inner_product_kernel(gene_ref, v_ref, wq_t_ref, bq_ref, out_ref):
    # gene2query on the MXU: bf16 operands, f32 accumulation.
    x = gene_ref[0].astype(jnp.bfloat16)                             # (TL, D)
    q = jnp.dot(x, wq_t_ref[...], preferred_element_type=jnp.float32)
    q = jax.nn.sigmoid(q + bq_ref[...])                              # (TL, D) f32

    # pred[l] = sum_k q[l,k] * v[k], contracted as (1,D) x (TL,D)^T so the
    # result is already a lane-dense (1, TL) row. Kept in f32 (tiny FLOPs;
    # v5e-friendly — no bf16 elementwise).
    pred = jax.lax.dot_general(
        v_ref[0], q, dimension_numbers=(((1,), (1,)), ((), ())),
        preferred_element_type=jnp.float32)                          # (1, TL)
    out_ref[0] = pred.astype(out_ref.dtype)                          # block (1,1,TL)


def mvc_decoder_inner_product(cell_emb, gene_embs, wq, bq, ww, *, tile_l=1024):
    """Pallas forward for MVCDecoder(arch_style='inner product').

    cell_emb:  (B, D)
    gene_embs: (B, L, D)
    wq: (D, D)  gene2query.weight, PyTorch (out_features, in_features) layout
    bq: (D,)    gene2query.bias
    ww: (D, D)  W.weight, PyTorch (out_features=d_in, in_features=d_model) layout,
                applied as q @ Ww^T (no bias). NOTE: square shape — a transposed
                weight cannot be detected at runtime; this layout is assumed.
    Returns dict(pred=(B, L) float32) — matches the PyTorch module's output.
    """
    B, L, D = gene_embs.shape

    # --- tile selection (no HBM pad of gene_embs; ragged last tile allowed) ---
    if L <= tile_l:
        tl = L                                   # single full-length tile (legal: == full dim)
    else:
        tl = max(128, (tile_l // 128) * 128)     # multiple of 128 -> lane-dense stores
    num_l_tiles = -(-L // tl)
    # v7x (2 TCs): prefer an even parallel grid so neither core idles on the tail.
    if num_l_tiles > 1 and (B * num_l_tiles) % 2 == 1 and tl >= 256:
        tl //= 2                                 # still a multiple of 128
        num_l_tiles = -(-L // tl)

    # Small resident operands, prepared once in the wrapper.
    wq_t = jnp.asarray(wq).astype(jnp.bfloat16).T        # (in, out): x @ wq_t == x @ Wq^T
    bq2 = jnp.asarray(bq, jnp.float32).reshape(1, D)
    # Hoisted projection: v[b,k] = sum_e cell[b,e] * Ww[e,k]  (== (q @ Ww^T) . cell hoisted).
    v = jnp.dot(cell_emb.astype(jnp.float32), jnp.asarray(ww, jnp.float32),
                preferred_element_type=jnp.float32)      # (B, D), tiny; keep f32
    v3 = v.reshape(B, 1, D)

    flops = 2 * B * L * D * D + 2 * B * L * D
    bytes_accessed = (gene_embs.size * gene_embs.dtype.itemsize   # streamed gene tiles
                      + wq_t.size * 2 + bq2.size * 4 + v3.size * 4
                      + B * L * 4)                                # output

    out = pl.pallas_call(
        _mvc_inner_product_kernel,
        out_shape=jax.ShapeDtypeStruct((B, 1, L), jnp.float32),
        grid_spec=pltpu.PrefetchScalarGridSpec(
            num_scalar_prefetch=0,
            grid=(B, num_l_tiles),
            in_specs=[
                pl.BlockSpec((1, tl, D), lambda b, t: (b, t, 0)),   # gene tile (streamed)
                pl.BlockSpec((1, 1, D), lambda b, t: (b, 0, 0)),    # v row (per batch)
                pl.BlockSpec((D, D), lambda b, t: (0, 0)),          # Wq^T (resident, bf16)
                pl.BlockSpec((1, D), lambda b, t: (0, 0)),          # bq   (resident, f32)
            ],
            out_specs=pl.BlockSpec((1, 1, tl), lambda b, t: (b, 0, t)),
        ),
        compiler_params=pltpu.CompilerParams(
            dimension_semantics=("parallel", "parallel"),
        ),
        cost_estimate=pl.CostEstimate(
            flops=flops,
            transcendentals=B * L * D,          # sigmoid exp
            bytes_accessed=bytes_accessed,
        ),
    )(gene_embs, v3, wq_t, bq2)

    # TODO(synk): for tiny L/D (<128) a batch-folded layout would restore lane-dense
    # stores / MXU M>=128; irrelevant for production scGPT-sized L.
    return {"pred": out[:, 0, :]}


def init_params(d_model, seed=42):
    """nn.Linear-style deterministic init: U(-1/sqrt(fan_in), +1/sqrt(fan_in))."""
    k_wq, k_bq, k_ww = jax.random.split(jax.random.PRNGKey(seed), 3)
    bound = 1.0 / (d_model ** 0.5)
    wq = jax.random.uniform(k_wq, (d_model, d_model), jnp.float32, -bound, bound)
    bq = jax.random.uniform(k_bq, (d_model,), jnp.float32, -bound, bound)
    ww = jax.random.uniform(k_ww, (d_model, d_model), jnp.float32, -bound, bound)
    return wq, bq, ww


if __name__ == "__main__":
    d_model = 32
    batch, seq_len = 2, 8

    wq, bq, ww = init_params(d_model)

    k_cell, k_gene = jax.random.split(jax.random.PRNGKey(0))
    cell_emb = jax.random.normal(k_cell, (batch, d_model), dtype=jnp.float32)
    gene_embs = jax.random.normal(k_gene, (batch, seq_len, d_model), dtype=jnp.float32)

    out = mvc_decoder_inner_product(cell_emb, gene_embs, wq, bq, ww)
    pred = jax.block_until_ready(out["pred"])
    assert pred.shape == (batch, seq_len)

    hp = jax.lax.Precision.HIGHEST

    # Reference 1: same bf16-MXU/f32-accumulate recipe as the kernel (tight check).
    q_bf = jax.nn.sigmoid(
        jnp.dot(gene_embs.astype(jnp.bfloat16), wq.astype(jnp.bfloat16).T,
                preferred_element_type=jnp.float32) + bq)
    v_ref = jnp.einsum("be,ek->bk", cell_emb, ww, precision=hp)       # cell @ Ww
    pred_bf_ref = jnp.einsum("bld,bd->bl", q_bf, v_ref, precision=hp)
    err_bf = float(jnp.max(jnp.abs(pred - pred_bf_ref)))
    assert err_bf < 1e-3, f"bf16-matched max abs err {err_bf}"

    # Reference 2: full f32 module math (loose check, catches layout mistakes).
    q_full = jax.nn.sigmoid(
        jnp.einsum("bld,ed->ble", gene_embs, wq, precision=hp) + bq)
    proj = jnp.einsum("bld,ed->ble", q_full, ww, precision=hp)        # W(query_vecs)
    pred_full = jnp.einsum("ble,be->bl", proj, cell_emb, precision=hp)
    err_full = float(jnp.max(jnp.abs(pred - pred_full)))
    assert err_full < 5e-2, f"f32-reference max abs err {err_full}"

    print("KERNEL_OK")
</pallas_src>

<mosaic_0001>
module attributes {stable_mosaic.version = 11 : i64} {
  func.func @_mvc_inner_product_kernel(%arg0: i32, %arg1: i32, %arg2: memref<1x8x32xf32, #tpu.memory_space<vmem>>, %arg3: memref<1x1x32xf32, #tpu.memory_space<vmem>>, %arg4: memref<32x32xbf16, #tpu.memory_space<vmem>>, %arg5: memref<1x32xf32, #tpu.memory_space<vmem>>, %arg6: memref<1x1x8xf32, #tpu.memory_space<vmem>>) attributes {dimension_semantics = [#tpu.dimension_semantics<parallel>, #tpu.dimension_semantics<parallel>], iteration_bounds = array<i64: 2, 1>, scalar_prefetch = 0 : i64, scratch_operands = 0 : i64, tpu.core_type = #tpu.core_type<tc>, window_params = [{transform_indices = @transform_0, window_bounds = array<i64: 1, 8, 32>}, {transform_indices = @transform_1, window_bounds = array<i64: 1, 1, 32>}, {pipeline_mode = #tpu.pipeline_mode<synchronous>, transform_indices = @transform_2, window_bounds = array<i64: 32, 32>}, {pipeline_mode = #tpu.pipeline_mode<synchronous>, transform_indices = @transform_3, window_bounds = array<i64: 1, 32>}, {transform_indices = @transform_4, window_bounds = array<i64: 1, 1, 8>}]} {
    %c0 = arith.constant 0 : index
    %c0_0 = arith.constant 0 : index
    %c0_1 = arith.constant 0 : index
    %0 = vector.load %arg2[%c0, %c0_0, %c0_1] : memref<1x8x32xf32, #tpu.memory_space<vmem>>, vector<1x8x32xf32>
    %1 = vector.shape_cast %0 : vector<1x8x32xf32> to vector<8x32xf32>
    %2 = arith.truncf %1 : vector<8x32xf32> to vector<8x32xbf16>
    %c0_2 = arith.constant 0 : index
    %c0_3 = arith.constant 0 : index
    %3 = vector.load %arg4[%c0_2, %c0_3] : memref<32x32xbf16, #tpu.memory_space<vmem>>, vector<32x32xbf16>
    %cst = arith.constant dense<0.000000e+00> : vector<8x32xf32>
    %4 = tpu.matmul %2, %3, %cst {dimension_numbers = #tpu.dot_dimension_numbers<[1], [0], [0], [1], [0, 0, 1, 1], [], []>} : vector<8x32xbf16>, vector<32x32xbf16>, vector<8x32xf32> -> vector<8x32xf32>
    %c0_4 = arith.constant 0 : index
    %c0_5 = arith.constant 0 : index
    %5 = vector.load %arg5[%c0_4, %c0_5] : memref<1x32xf32, #tpu.memory_space<vmem>>, vector<1x32xf32>
    %6 = vector.broadcast %5 : vector<1x32xf32> to vector<8x32xf32>
    %7 = arith.addf %4, %6 : vector<8x32xf32>
    %8 = arith.negf %7 : vector<8x32xf32>
    %9 = math.exp %8 : vector<8x32xf32>
    %cst_6 = arith.constant 1.000000e+00 : f32
    %10 = vector.broadcast %cst_6 : f32 to vector<8x32xf32>
    %11 = arith.addf %10, %9 : vector<8x32xf32>
    %12 = arith.divf %10, %11 : vector<8x32xf32>
    %c0_7 = arith.constant 0 : index
    %c0_8 = arith.constant 0 : index
    %c0_9 = arith.constant 0 : index
    %13 = vector.load %arg3[%c0_7, %c0_8, %c0_9] : memref<1x1x32xf32, #tpu.memory_space<vmem>>, vector<1x1x32xf32>
    %14 = vector.shape_cast %13 : vector<1x1x32xf32> to vector<1x32xf32>
    %cst_10 = arith.constant dense<0.000000e+00> : vector<1x8xf32>
    %15 = tpu.matmul %14, %12, %cst_10 {dimension_numbers = #tpu.dot_dimension_numbers<[1], [1], [0], [0], [0, 0, 1, 0], [], []>} : vector<1x32xf32>, vector<8x32xf32>, vector<1x8xf32> -> vector<1x8xf32>
    %c0_11 = arith.constant 0 : index
    %c0_12 = arith.constant 0 : index
    %c0_13 = arith.constant 0 : index
    %16 = vector.load %arg6[%c0_11, %c0_12, %c0_13] : memref<1x1x8xf32, #tpu.memory_space<vmem>>, vector<1x1x8xf32>
    %17 = vector.shape_cast %16 : vector<1x1x8xf32> to vector<1x8xf32>
    %18 = vector.shape_cast %15 : vector<1x8xf32> to vector<1x1x8xf32>
    tpu.vector_store %arg6[%c0_11, %c0_12, %c0_13], %18 {strides = array<i32>} : memref<1x1x8xf32, #tpu.memory_space<vmem>>, vector<1x1x8xf32>,
    return
  }
  func.func @transform_0(%arg0: i32, %arg1: i32) -> (i32, i32, i32) {
    %c0_i32 = arith.constant 0 : i32
    %c0_i32_0 = arith.constant 0 : i32
    return %arg0, %arg1, %c0_i32 : i32, i32, i32
  }
  func.func @transform_1(%arg0: i32, %arg1: i32) -> (i32, i32, i32) {
    %c0_i32 = arith.constant 0 : i32
    %c0_i32_0 = arith.constant 0 : i32
    %c0_i32_1 = arith.constant 0 : i32
    return %arg0, %c0_i32, %c0_i32_0 : i32, i32, i32
  }
  func.func @transform_2(%arg0: i32, %arg1: i32) -> (i32, i32) {
    %c0_i32 = arith.constant 0 : i32
    %c0_i32_0 = arith.constant 0 : i32
    %c0_i32_1 = arith.constant 0 : i32
    return %c0_i32, %c0_i32_0 : i32, i32
  }
  func.func @transform_3(%arg0: i32, %arg1: i32) -> (i32, i32) {
    %c0_i32 = arith.constant 0 : i32
    %c0_i32_0 = arith.constant 0 : i32
    %c0_i32_1 = arith.constant 0 : i32
    return %c0_i32, %c0_i32_0 : i32, i32
  }
  func.func @transform_4(%arg0: i32, %arg1: i32) -> (i32, i32, i32) {
    %c0_i32 = arith.constant 0 : i32
    %c0_i32_0 = arith.constant 0 : i32
    return %arg0, %c0_i32, %arg1 : i32, i32, i32
  }
}

</mosaic_0001>

<bundles_post_ra>
// kernel: tpu_custom_call.1
= control target key start
LH: loop header
LB: loop body
LE: loop exit
PB: predicated region body
PF: predicated region fallthrough
CT: control target
= control target key end

     0   :  { %9 = vsyncpa [#allocation3], 0  ;;  %s1047_s0 = inlined_call_operand.hbm [shape: f32[2,8,32], index: 0, kind: input, shape index: {}]   ;;  %s1048_s1 = inlined_call_operand.vmem [shape: f32[2,1,32], index: 1, kind: input, shape index: {}]   ;;  %s1049_s2 = inlined_call_operand.hbm [shape: bf16[32,32], index: 2, kind: input, shape index: {}]   ;;  %s1050_s3 = inlined_call_operand.vmem [shape: f32[1,32], index: 3, kind: input, shape index: {}]   ;;  %s1051_s4 = inlined_call_operand.hbm [shape: f32[2,1,8], index: 4, kind: output, shape index: {}]  }
   0x1   :  { %11 = vsyncpa [#allocation3 + $0x1], 0 }
   0x2   :  { %12 = vsyncpa [#allocation6], 0 }
   0x3   :  { %13 = vsyncpa [#allocation4], 0 }
   0x4   :  { %15 = vsyncpa [#allocation4 + $0x1], 0  ;;  %s821_s15 = smov 0   ;;  %s823_s16 = smov 0  }
   0x5   :  { %s825_s17 = smov 0   ;;  %s827_s18 = smov 0  }
   0x6   :  { %s829_s19 = smov 0   ;;  %s831_s20 = smov 0  }
   0x7 LB: > { %s522_s21 = sadd.s32 4294967295, %s787_s20   ;;  %s523_s22 = sadd.s32 4294967294, %s787_s20   ;;  %s787_s20 = sphi %s831_s20, %s21_s20   ;;  %s783_s19 = sphi %s829_s19, %s1075_s19   ;;  %s779_s18 = sphi %s827_s18, %s1074_s18   ;;  %s775_s17 = sphi %s825_s17, %s1073_s17   ;;  %s771_s16 = sphi %s823_s16, %s1072_s16   ;;  %s767_s15 = sphi %s821_s15, %s1071_s15  }
   0x8   : > { %p55_p0 = scmp.ne.s32.totalorder %s771_s16, %s767_s15  ;;  %p855_p1 = scmp.eq.s32.totalorder %s522_s21, 0 }
   0x9   : > { %p859_p2 = scmp.eq.s32.totalorder %s522_s21, 1  ;;  %p155_p3 = scmp.eq.s32.totalorder %s523_s22, 1 }
   0xa   : > { %s1056_s23 = scalar_select %p855_p1, 1, 0 }
   0xb   : > { %s1057_s24 = scalar_select %p859_p2, 1, 0 }
   0xc   : > { %p865_p4 = por %p855_p1, %p55_p0  ;;  %p524_p5 = scmp.ge.s32.totalorder %s787_s20, 1 }
   0xd   : > { %p870_p6 = por %p155_p3, %p55_p0  ;;  %p162_p7 = scmp.lt.s32.totalorder %s787_s20, 3 }
   0xe   : > { %s1058_s25 = scalar_select %p865_p4, 1, 0 }
   0xf   : > { %s1059_s26 = scalar_select %p870_p6, 1, 0 }
  0x10   : > { %p875_p8 = pnand %p524_p5, %p162_p7  ;;  %s789_s28 = smov [#allocation5]  }
  0x11   : > { %s174_s29 = sshll.u32 %s789_s28, 4  ;;  %s33_s5 = sadd.s32 1, %s783_s19  ;;  %s175_s29 = int_to_ptr.vmem [resolvable:$true] %s174_s29 }
  0x12   : > { %s1060_s27 = scalar_select %p875_p8, 1, 0 }
  0x13   : > { %p568_p9 = pneg %p875_p8  ;;  %s643_s8 = scalar_lea.hbm %s1049_s2, 256 }
  0x14   : > { %p644_p12 = scmp.ne.s32.totalorder %s1049_s2, %s643_s8  ;;  %p650_p5 = scmp.lt.u32.totalorder %s643_s8, %s1049_s2 }
  0x15   : > { %p884_p11 = pnand %p568_p9, %p855_p1 }
  0x17   : > { %p645_p13 = pneg %p884_p11 }
  0x19   : > { %p646_p0 = pnand %p645_p13, %p644_p12 }
  0x1b   : > { %p647_p3 = pneg %p646_p0 }
  0x1d   : > { %p652_p7 = pnand %p650_p5, %p647_p3 }
  0x1f   : > { %655 = shalt.err (!%p652_p7)
}
  0x20   : > { %s656_s13 = scalar_lea.vmem %s175_s29, 256  ;;  %p664_p1 = scmp.lt.s32.totalorder %s175_s29, %s175_s29 }
  0x21   : > { %p657_p9 = scmp.ne.s32.totalorder %s175_s29, %s656_s13  ;;  %p665_p4 = scmp.lt.s32.totalorder %s656_s13, %s656_s13 }
  0x23   : > { %p659_p10 = pnand %p657_p9, %p645_p13  ;;  %p666_p8 = por %p665_p4, %p664_p1 }
  0x25   : > { %p660_p6 = pneg %p659_p10 }
  0x27   : > { %p667_p2 = pnand %p666_p8, %p660_p6 }
  0x29   : > { %670 = shalt.err (!%p667_p2)
}
  0x2a   : > { %s790_s14 = smov 64   ;;  %s791_s21 = smov 4  }
  0x2b   : > { %571 = dma.hbm_to_vmem [thread:$0]  (!%p884_p11), %s1049_s2, 256, %s175_s29, [#allocation6], %s790_s14, %s790_s14, %s791_s21  }
  0x2c   : > { %p35_p1 = scmp.ge.s32.totalorder %s33_s5, 2  ;;  %s42_s6 = sadd.s32 1, %s775_s17 }
  0x2d   : > { %p49_p2 = scmp.ne.s32.totalorder %s775_s17, %s771_s16  ;;  %p50_p4 = scmp.eq.s32.totalorder %s787_s20, 0 }
  0x2e   : > { %s1077_s5 = smov (%p35_p1, %s33_s5), 0  ;;  %p1063_p8 = scmp.ne.s32.totalorder %s1057_s24, 0 }
  0x2f   : > { %p911_p6 = por %p50_p4, %p49_p2  ;;  %s37_s30 = ssub.s32 %s783_s19, %s1077_s5 }
  0x30   : > { %p917_p10 = por %p1063_p8, %p49_p2  ;;  %p581_p12 = scmp.lt.s32.totalorder %s787_s20, 2 }
  0x31   : > { %p40_p11 = scmp.eq.s32.totalorder %s37_s30, 0  ;;  %s191_s29 = sand.u32 1, %s775_s17  }
  0x32   : > { %s527_s9 = sshll.u32 %s191_s29, 3  ;;  %s528_s11 = sshll.u32 %s783_s19, 7 }
  0x33   : > { %s926_s10 = scalar_select %p40_p11, %s775_s17, %s42_s6  }
  0x34   : > { %s932_s14 = scalar_lea.hbm %s1047_s0, %s528_s11  ;;  %s195_s24 = scalar_lea.vmem [#allocation2], %s527_s9 }
  0x35   : > { %s203_s21 = sshll.u32 %s195_s24, 4  ;;  %p938_p13 = pnand %p581_p12, %p911_p6  ;;  %s934_s21 = int_to_ptr.vmem [resolvable:$true] %s203_s21 }
  0x36   : > { %s192_s28 = scalar_lea.sflag [#allocation3], %s191_s29  ;;  %s671_s6 = scalar_lea.hbm %s932_s14, 128 }
  0x37   : > { %p672_p0 = scmp.ne.s32.totalorder %s932_s14, %s671_s6  ;;  %p673_p3 = pneg %p938_p13 }
  0x38   : > { %s676_s11 = scalar_lea.hbm %s1047_s0, 256  ;;  %p677_p9 = scmp.lt.u32.totalorder %s932_s14, %s1047_s0 }
  0x39   : > { %p674_p5 = pnand %p673_p3, %p672_p0  ;;  %p678_p1 = scmp.lt.u32.totalorder %s676_s11, %s671_s6 }
  0x3a   : > { %p680_p4 = scmp.lt.u32.totalorder %s671_s6, %s932_s14 }
  0x3b   : > { %p675_p7 = pneg %p674_p5  ;;  %p679_p2 = por %p678_p1, %p677_p9 }
  0x3d   : > { %p681_p6 = por %p680_p4, %p679_p2 }
  0x3f   : > { %p682_p8 = pnand %p681_p6, %p675_p7 }
  0x41   : > { %685 = shalt.err (!%p682_p8)
}
  0x42   : > { %s686_s29 = scalar_lea.vmem %s934_s21, 128  ;;  %s792_s13 = smov [#allocation2]  }
  0x43   : > { %p687_p12 = scmp.ne.s32.totalorder %s934_s21, %s686_s29  ;;  %s691_s24 = sshll.u32 %s792_s13, 4  ;;  %s692_s24 = int_to_ptr.vmem [resolvable:$false] %s691_s24 }
  0x44   : > { %s693_s30 = scalar_lea.vmem %s692_s24, 256  ;;  %p694_p5 = scmp.lt.s32.totalorder %s934_s21, %s692_s24 }
  0x45   : > { %p689_p11 = pnand %p687_p12, %p673_p3  ;;  %p695_p9 = scmp.lt.s32.totalorder %s693_s30, %s686_s29 }
  0x47   : > { %p690_p0 = pneg %p689_p11  ;;  %p696_p1 = por %p695_p9, %p694_p5 }
  0x49   : > { %p697_p2 = pnand %p696_p1, %p690_p0 }
  0x4b   : > { %700 = shalt.err (!%p697_p2)
}
  0x4c   : > { %575 = dma.hbm_to_vmem [thread:$0]  (!%p938_p13), %s932_s14, 128, %s934_s21, %s192_s28  }
  0x4d   : > { %p1066_p7 = scmp.ne.s32.totalorder %s1060_s27, 0 }
  0x4e   : > { %s970_s6 = sand.u32 (!%p1066_p7), 1, %s771_s16   ;;  %p1067_p3 = scmp.ne.s32.totalorder (!%p1066_p7), %s1058_s25, 0 }
  0x4f   : > { %218 = sbr.rel (%p1066_p7) target bundleno = 569 (0x239), region = 36  ;;  %s530_s9 = sshll.u32 (!%p1066_p7), %s970_s6, 3 }
  0x50   : > { %s221_s11 = scalar_lea.sflag (!%p1066_p7), [#allocation3], %s970_s6  ;;  %s224_s7 = scalar_lea.vmem (!%p1066_p7), [#allocation2], %s530_s9 }
  0x56   : > { %754 = dma.done.wait (%p1067_p3), %s221_s11, 128  }
  0x57   : > { %756 = vsyncadd (%p1067_p3), %s221_s11, 4294967168  ;;  %p1068_p4 = scmp.ne.s32.totalorder %s1056_s23, 0 }
  0x59   : > { %758 = dma.done.wait (%p1068_p4), [#allocation6], 256  }
  0x5a   : > { %760 = vsyncadd (%p1068_p4), [#allocation6], 4294967040  ;;  %v793_v0 = vmov 0.0   ;;  %vm794_vm0 = vmmov 0   ;;  %v637_v1 = vld [vmem:[#allocation5] sm:$0xff]   ;;  %v638_v2 = vld [vmem:[#allocation5 + $0x8] sm:$0xff]  }
  0x5b   : > { %547 = vmatprep.subr.bf16.mxu0 %v793_v0  ;;  %551 = vmatprep.mubr.msk.bf16.mxu0 %vm794_vm0, %v793_v0  ;;  %v259_v3 = vld [vmem:[%s224_s7] sm:$0xff]  ;;  %vm284_vm1 = vcmask 261120   ;;  %p255_p13 = scmp.lt.s32.totalorder %s779_s18, 1  ;;  %s539_s28 = sshll.u32 %s779_s18, 4  ;;  %vm411_vm2 = vcmask 57344  }
  0x5c   : > { %555 = vmatprep.subr.mxu1 %v793_v0  ;;  %557 = vmatprep.mubr.msk.f32.mxu1 %vm794_vm0, %v793_v0  ;;  %v260_v4 = vpack.c.bf16 %v259_v3, %v259_v3  ;;  %v532_v5 = vld [vmem:[%s1050_s3] ss:$0 sm:$0xff]  ;;  %s254_s12 = scalar_lea.vmem [#allocation7], %s970_s6  ;;  %s998_s30 = scalar_lea.hbm %s1051_s4, %s539_s28 }
  0x5d   : > { %548 = vmatpush3.bf16.msra.mxu0 %v637_v1  ;;  %s256_s27 = scalar_select %p255_p13, %s779_s18, 1 }
  0x5e   : > { %549 = vmatprep.subr.bf16.mxu0 %v793_v0  ;;  %s427_s29 = sshll.u32 %s254_s12, 4  ;;  %s414_s9 = scalar_lea.sflag [#allocation4], %s970_s6  ;;  %s1000_s29 = int_to_ptr.vmem [resolvable:$true] %s427_s29 }
  0x5f   : > { %s257_s22 = scalar_lea.vmem %s1048_s1, %s256_s27  ;;  %s701_s11 = scalar_lea.vmem %s1000_s29, 16 }
  0x60   : > { %v334_v15 = vld [vmem:[%s257_s22] sm:$0x1]  ;;  %p702_p6 = scmp.ne.s32.totalorder %s1000_s29, %s701_s11  ;;  %s795_s18 = smov [#allocation7]  }
  0x61   : > { %550 = vmatpush3.bf16.msra.mxu0 %v638_v2  ;;  %s705_s7 = sshll.u32 %s795_s18, 4  ;;  %s706_s7 = int_to_ptr.vmem [resolvable:$false] %s705_s7 }
  0x62   : > { %p703_p8 = pnand %p702_p6, %p917_p10  ;;  %s707_s23 = scalar_lea.vmem %s706_s7, 32 }
  0x63   : > { %p708_p11 = scmp.lt.s32.totalorder %s1000_s29, %s706_s7  ;;  %p709_p0 = scmp.lt.s32.totalorder %s707_s23, %s701_s11 }
  0x64   : > { %552 = vmatmul.mubr.msk.bf16.vlgmr.msra.gmra.mrb[0].mxu0 %vm284_vm1, %v260_v4  ;;  %p704_p12 = pneg %p703_p8 }
  0x65   : > { %p710_p5 = por %p709_p0, %p708_p11 }
  0x67   : > { %p711_p9 = pnand %p710_p5, %p704_p12 }
 0x137   : > { %v322_v6 = vpop.f32.mrb[0].mxu0 }
 0x138   : > { %v323_v7 = vadd.f32 %v532_v5, %v322_v6  ;;  %v553_v8 = vpop.f32.mrb[1].mxu0 }
 0x139   : > { %v325_v9 = vpop.f32.mrb[2].mxu0 }
 0x13a   : > { %v536_v10 = vmul.f32 -1.442695, %v323_v7  ;;  %v554_v11 = vpop.f32.mrb[3].mxu0 }
 0x13c   : > { %639 = vpow2.f32 %v536_v10 }
 0x146   : > { %v640_v12 = vpop.eup %639 }
 0x147   : > { %v331_v13 = vadd.f32 1.0, %v640_v12 }
 0x149   : > { %641 = vrcp.f32 %v331_v13 }
 0x153   : > { %v642_v14 = vpop.eup %641 }
 0x154   : > { %556 = vmatpush3.xpose.msk.msra.mxu1 %vm284_vm1, %v642_v14 }
 0x157   : > { %558 = vmatmul.mubr.msk.f32.vlgmr.msra.gmra.mrb[0].mxu1 %vm284_vm1, %v334_v15 }
 0x22a   : > { %v407_v16 = vpop.f32.mrb[0].mxu1 }
 0x22b   : > { %412 = vst.msk [vmem:[%s254_s12] sm:$0x1] %vm411_vm2, %v407_v16  ;;  %v559_v17 = vpop.f32.mrb[1].mxu1 }
 0x22c   : > { %714 = shalt.err (!%p711_p9)
}
 0x22d   : > { %s715_s6 = scalar_lea.hbm %s998_s30, 16  ;;  %s719_s14 = scalar_lea.hbm %s1051_s4, 32 }
 0x22e   : > { %p716_p1 = scmp.ne.s32.totalorder %s998_s30, %s715_s6  ;;  %p720_p3 = scmp.lt.u32.totalorder %s998_s30, %s1051_s4 }
 0x22f   : > { %p721_p4 = scmp.lt.u32.totalorder %s719_s14, %s715_s6  ;;  %p723_p6 = scmp.lt.u32.totalorder %s715_s6, %s998_s30 }
 0x230   : > { %p717_p2 = pnand %p716_p1, %p917_p10 }
 0x231   : > { %p722_p13 = por %p721_p4, %p720_p3 }
 0x232   : > { %p718_p7 = pneg %p717_p2 }
 0x233   : > { %p724_p8 = por %p723_p6, %p722_p13 }
 0x235   : > { %p725_p12 = pnand %p724_p8, %p718_p7 }
 0x237   : > { %728 = shalt.err (!%p725_p12)
}
 0x238   : > { %566 = dma.vmem_to_hbm [thread:$0]  (%p917_p10), %s1000_s29, 16, %s998_s30, %s414_s9  }
 0x239 PF: > { %s439_s28 = sand.u32 1, %s767_s15   ;;  %p1069_p11 = scmp.ne.s32.totalorder %s1059_s26, 0 }
 0x23a   : > { %p1070_p0 = scmp.ge.s32.totalorder %s787_s20, 2  ;;  %s440_s12 = scalar_lea.sflag [#allocation4], %s439_s28 }
 0x23c   : > { %p577_p5 = pnand %p1070_p0, %p1069_p11 }
 0x23e   : > { %762 = dma.done.wait (!%p577_p5), %s440_s12, 16  }
 0x23f   : > { %764 = vsyncadd (!%p577_p5), %s440_s12, 4294967280  ;;  %s21_s20 = sadd.s32 1, %s787_s20   ;;  %s1071_s15 = smov %s771_s16 }
 0x240   : > { %p18_p9 = scmp.ge.s32.totalorder %s21_s20, 4   ;;  %s1072_s16 = smov %s775_s17 }
 0x241   : > { %s1073_s17 = smov %s926_s10  ;;  %s1074_s18 = smov %s783_s19 }
 0x242   : > { %s1075_s19 = smov %s1077_s5  ;;  %20 = sbr.rel (!%p18_p9) target bundleno = 7 (0x7), region = 88 }
 0x249   :  { %444 = vsyncpa [#allocation3], 1 }
 0x24a   :  { %446 = vsyncpa [#allocation3 + $0x1], 1 }
 0x24b   :  { %447 = vsyncpa [#allocation6], 1 }
 0x24c   :  { %448 = vsyncpa [#allocation4], 1 }
 0x24d   :  { %450 = vsyncpa [#allocation4 + $0x1], 1 }

</bundles_post_ra>
